<compile_context>
chip_gen: v7x
topology: tpu7x:2x2x1
jax: 0.10.0
libtpu: 0.0.40
codegen_flags: <defaults>
</compile_context>

<pallas_src>
import jax
import jax.numpy as jnp
from jax.experimental import pallas as pl
from jax.experimental.pallas import tpu as pltpu


# ----------------------------------- kernel -----------------------------------

def _att_rnn_decoder_kernel(x_ref, wg_ref, bg_ref, bhn_ref, wp_ref, bo_ref, out_ref):
    # x_ref : (B, tT, D)    time tile of the input, batch-major (no wrapper transpose)
    # wg_ref: (D, 3H)       fused GRU input weights  [r | z | n]
    # bg_ref: (1, 3H)       fused biases             [b_ir+b_hr | b_iz+b_hz | b_in]
    # bhn_ref:(1, H)        b_hn (multiplied by the reset gate)
    # wp_ref: (H, P)        fused projection: col 0 = attn vector, cols 1..O = W_l^T
    # bo_ref: (1, P)        output bias padded into the slab (col 0 and cols >O are 0)
    # out_ref:(tT, P)       lane-dense output slab
    B, tT, D = x_ref.shape
    H = bhn_ref.shape[-1]

    # Merge leading dims only (lane dim untouched; tT is sublane-aligned) -> (B*tT, D).
    xf = x_ref[...].reshape(B * tT, D)

    # ---- GRU gates: one fused MXU matmul, N = 3H --------------------------------
    g = jnp.dot(xf, wg_ref[...], preferred_element_type=jnp.float32) + bg_ref[...]

    rz = jax.nn.sigmoid(g[:, : 2 * H])          # single EUP pass over the r|z slice
    r = rz[:, :H]
    z = rz[:, H:]
    n = jnp.tanh(g[:, 2 * H:] + r * bhn_ref[...])
    h = (1.0 - z) * n                           # h_prev == 0  =>  h' = (1 - z) * n

    # ---- fused [attention-logit | output-projection] MXU matmul, lane-dense N=P --
    # hp[:, 0]    = h @ w_attn            (attention logits)
    # hp[:, 1+o]  = h @ W_l[o, :]         (per-row output-projection contributions)
    hp = jnp.dot(h, wp_ref[...], preferred_element_type=jnp.float32)     # (B*tT, P)

    # ---- softmax over the batch axis + attention-weighted combine ----------------
    # Rows of batch b live at [b*tT : (b+1)*tT] -> static, tile-aligned slices; the
    # combine over B is a leading-axis (vreg-wise) VPU reduction, no XLU involved.
    # out[t, 1+o] = sum_b softmax_b(logit) * (h_b @ W_l)[o] == (context_t @ W_l)[o]
    logit = [hp[b * tT:(b + 1) * tT, 0:1] for b in range(B)]              # (tT, 1) each
    m = logit[0]
    for b in range(1, B):
        m = jnp.maximum(m, logit[b])

    e0 = jnp.exp(logit[0] - m)
    denom = e0
    acc = e0 * hp[0:tT, :]
    for b in range(1, B):
        e_b = jnp.exp(logit[b] - m)
        denom = denom + e_b
        acc = acc + e_b * hp[b * tT:(b + 1) * tT, :]

    out_ref[...] = acc / denom + bo_ref[...]                              # (tT, P)


# ----------------------------------- wrapper -----------------------------------

def _pick_time_tile(T, max_tile=128):
    """Time-tile size: whole T when small, else a sublane-aligned divisor of T.

    max_tile keeps 2x(double-buffered) input tiles + resident weights comfortably
    under the 32 MiB default scoped-VMEM limit (v7x physical VMEM is only 64 MiB).
    """
    if T <= max_tile:
        return T
    for cand in range(max_tile, 7, -1):
        if T % cand == 0 and cand % 8 == 0:
            return cand
    for cand in range(max_tile, 0, -1):
        if T % cand == 0:
            return cand
    return T


def att_rnn_decoder(x, kp, output_dim):
    """x: (B, T, D) float32.  Returns (output_dim, T), like the torch module."""
    B, T, D = x.shape
    H = kp["b_hn"].shape[-1]
    P = kp["w_proj"].shape[-1]
    tT = _pick_time_tile(T)
    grid = (T // tT,)

    args = (x, kp["w_gates"], kp["b_gates"], kp["b_hn"], kp["w_proj"], kp["b_out"])

    in_specs = [
        pl.BlockSpec((B, tT, D), lambda t: (0, t, 0)),     # time-tiled input (no transpose)
        pl.BlockSpec((D, 3 * H), lambda t: (0, 0)),        # weights stay VMEM-resident
        pl.BlockSpec((1, 3 * H), lambda t: (0, 0)),
        pl.BlockSpec((1, H), lambda t: (0, 0)),
        pl.BlockSpec((H, P), lambda t: (0, 0)),
        pl.BlockSpec((1, P), lambda t: (0, 0)),
    ]
    out_spec = pl.BlockSpec((tT, P), lambda t: (t, 0))

    cost = pl.CostEstimate(
        flops=int(2 * B * T * D * (3 * H) + 2 * B * T * H * P + 10 * B * T * H),
        transcendentals=int(B * T * (3 * H) + B * T),
        bytes_accessed=int(4 * (B * T * D + D * 3 * H + 3 * H + H + H * P + P + T * P)),
    )

    out_slab = pl.pallas_call(
        _att_rnn_decoder_kernel,
        out_shape=jax.ShapeDtypeStruct((T, P), jnp.float32),
        grid=grid,
        in_specs=in_specs,
        out_specs=out_spec,
        compiler_params=pltpu.CompilerParams(dimension_semantics=("parallel",)),
        cost_estimate=cost,
    )(*args)

    # torch: stack of seq_len vectors of shape (output_dim,) along dim=1 -> (O, T).
    return out_slab[:, 1:1 + output_dim].T


# --------------- deterministic parameter setup (PyTorch-style shapes) ---------------

def init_raw_params(key, input_dim, hidden_dim, output_dim):
    ks = jax.random.split(key, 8)
    k = 1.0 / jnp.sqrt(jnp.float32(hidden_dim))
    u = lambda kk, shape: jax.random.uniform(kk, shape, jnp.float32, -k, k)
    return dict(
        W_ih=u(ks[0], (3 * hidden_dim, input_dim)),   # GRUCell weight_ih (r|z|n)
        W_hh=u(ks[1], (3 * hidden_dim, hidden_dim)),  # GRUCell weight_hh (unused: h == 0)
        b_ih=u(ks[2], (3 * hidden_dim,)),
        b_hh=u(ks[3], (3 * hidden_dim,)),
        W_a=u(ks[4], (1, hidden_dim)),                # attn Linear
        b_a=u(ks[5], (1,)),                           # cancels in batch-softmax
        W_l=u(ks[6], (output_dim, hidden_dim)),       # output Linear
        b_l=u(ks[7], (output_dim,)),
    )


def to_kernel_params(p, H, O):
    W_ih, b_ih, b_hh = p["W_ih"], p["b_ih"], p["b_hh"]

    # Fused gate weight (D, 3H) and bias (1, 3H).  b_hn stays separate (gated by r).
    w_gates = W_ih.T
    b_gates = jnp.concatenate([b_ih[:2 * H] + b_hh[:2 * H], b_ih[2 * H:]])[None, :]
    b_hn = b_hh[2 * H:][None, :]

    # Fused, lane-padded [attn | linear] projection.  b_a is dropped (softmax no-op).
    P = ((O + 1 + 127) // 128) * 128
    w_proj = jnp.zeros((H, P), jnp.float32)
    w_proj = w_proj.at[:, 0].set(p["W_a"][0])
    w_proj = w_proj.at[:, 1:1 + O].set(p["W_l"].T)
    b_out = jnp.zeros((1, P), jnp.float32).at[0, 1:1 + O].set(p["b_l"])

    return dict(w_gates=w_gates, b_gates=b_gates, b_hn=b_hn, w_proj=w_proj, b_out=b_out)


# --------------- pure-JAX reference (literal translation of the torch loop) ---------------

def reference(x, p):
    B, T, D = x.shape
    H = p["W_hh"].shape[1]
    c = jnp.zeros((B, H), jnp.float32)   # never updated, exactly like the torch code
    outs = []
    for t in range(T):
        x_t = x[:, t, :]
        gi = x_t @ p["W_ih"].T + p["b_ih"]
        gh = c @ p["W_hh"].T + p["b_hh"]
        r = jax.nn.sigmoid(gi[:, :H] + gh[:, :H])
        z = jax.nn.sigmoid(gi[:, H:2 * H] + gh[:, H:2 * H])
        n = jnp.tanh(gi[:, 2 * H:] + r * gh[:, 2 * H:])
        h = (1.0 - z) * n + z * c
        logits = h @ p["W_a"].T + p["b_a"]        # (B, 1)
        aw = jax.nn.softmax(logits, axis=0)       # softmax over the batch
        context = jnp.sum(h * aw, axis=0)         # (H,)
        outs.append(context @ p["W_l"].T + p["b_l"])  # (O,)
    return jnp.stack(outs, axis=1)                # (O, T)


if __name__ == "__main__":
    B, T = 8, 8
    D = H = 32          # the torch code requires input_dim == hidden_dim
    O = 16

    key = jax.random.PRNGKey(0)
    kx, kparam = jax.random.split(key)
    x = jax.random.normal(kx, (B, T, D), jnp.float32)

    raw = init_raw_params(kparam, D, H, O)
    kparams = to_kernel_params(raw, H, O)

    out = jax.block_until_ready(att_rnn_decoder(x, kparams, O))
    ref = jax.block_until_ready(reference(x, raw))

    assert out.shape == (O, T), out.shape
    err = float(jnp.max(jnp.abs(out - ref)))
    assert jnp.allclose(out, ref, atol=2e-4, rtol=2e-4), err
    print("KERNEL_OK")
</pallas_src>

<mosaic_0001>
module attributes {stable_mosaic.version = 11 : i64} {
  func.func @_att_rnn_decoder_kernel(%arg0: i32, %arg1: memref<8x8x32xf32, #tpu.memory_space<vmem>>, %arg2: memref<32x96xf32, #tpu.memory_space<vmem>>, %arg3: memref<1x96xf32, #tpu.memory_space<vmem>>, %arg4: memref<1x32xf32, #tpu.memory_space<vmem>>, %arg5: memref<32x128xf32, #tpu.memory_space<vmem>>, %arg6: memref<1x128xf32, #tpu.memory_space<vmem>>, %arg7: memref<8x128xf32, #tpu.memory_space<vmem>>) attributes {dimension_semantics = [#tpu.dimension_semantics<parallel>], iteration_bounds = array<i64: 1>, scalar_prefetch = 0 : i64, scratch_operands = 0 : i64, tpu.core_type = #tpu.core_type<tc>, window_params = [{transform_indices = @transform_0, window_bounds = array<i64: 8, 8, 32>}, {pipeline_mode = #tpu.pipeline_mode<synchronous>, transform_indices = @transform_1, window_bounds = array<i64: 32, 96>}, {pipeline_mode = #tpu.pipeline_mode<synchronous>, transform_indices = @transform_2, window_bounds = array<i64: 1, 96>}, {pipeline_mode = #tpu.pipeline_mode<synchronous>, transform_indices = @transform_3, window_bounds = array<i64: 1, 32>}, {pipeline_mode = #tpu.pipeline_mode<synchronous>, transform_indices = @transform_4, window_bounds = array<i64: 32, 128>}, {pipeline_mode = #tpu.pipeline_mode<synchronous>, transform_indices = @transform_5, window_bounds = array<i64: 1, 128>}, {transform_indices = @transform_6, window_bounds = array<i64: 8, 128>}]} {
    %c0 = arith.constant 0 : index
    %c0_0 = arith.constant 0 : index
    %c0_1 = arith.constant 0 : index
    %0 = vector.load %arg1[%c0, %c0_0, %c0_1] : memref<8x8x32xf32, #tpu.memory_space<vmem>>, vector<8x8x32xf32>
    %1 = vector.shape_cast %0 : vector<8x8x32xf32> to vector<64x32xf32>
    %c0_2 = arith.constant 0 : index
    %c0_3 = arith.constant 0 : index
    %2 = vector.load %arg2[%c0_2, %c0_3] : memref<32x96xf32, #tpu.memory_space<vmem>>, vector<32x96xf32>
    %cst = arith.constant dense<0.000000e+00> : vector<64x96xf32>
    %3 = tpu.matmul %1, %2, %cst {dimension_numbers = #tpu.dot_dimension_numbers<[1], [0], [0], [1], [0, 0, 1, 1], [], []>} : vector<64x32xf32>, vector<32x96xf32>, vector<64x96xf32> -> vector<64x96xf32>
    %c0_4 = arith.constant 0 : index
    %c0_5 = arith.constant 0 : index
    %4 = vector.load %arg3[%c0_4, %c0_5] : memref<1x96xf32, #tpu.memory_space<vmem>>, vector<1x96xf32>
    %5 = vector.broadcast %4 : vector<1x96xf32> to vector<64x96xf32>
    %6 = arith.addf %3, %5 : vector<64x96xf32>
    %7 = vector.extract_strided_slice %6 {offsets = [0, 0], sizes = [64, 64], strides = [1, 1]} : vector<64x96xf32> to vector<64x64xf32>
    %8 = arith.negf %7 : vector<64x64xf32>
    %9 = math.exp %8 : vector<64x64xf32>
    %cst_6 = arith.constant 1.000000e+00 : f32
    %10 = vector.broadcast %cst_6 : f32 to vector<64x64xf32>
    %11 = arith.addf %10, %9 : vector<64x64xf32>
    %12 = arith.divf %10, %11 : vector<64x64xf32>
    %13 = vector.extract_strided_slice %12 {offsets = [0, 0], sizes = [64, 32], strides = [1, 1]} : vector<64x64xf32> to vector<64x32xf32>
    %14 = vector.extract_strided_slice %12 {offsets = [0, 32], sizes = [64, 32], strides = [1, 1]} : vector<64x64xf32> to vector<64x32xf32>
    %15 = vector.extract_strided_slice %6 {offsets = [0, 64], sizes = [64, 32], strides = [1, 1]} : vector<64x96xf32> to vector<64x32xf32>
    %c0_7 = arith.constant 0 : index
    %c0_8 = arith.constant 0 : index
    %16 = vector.load %arg4[%c0_7, %c0_8] : memref<1x32xf32, #tpu.memory_space<vmem>>, vector<1x32xf32>
    %17 = vector.broadcast %16 : vector<1x32xf32> to vector<64x32xf32>
    %18 = arith.mulf %13, %17 : vector<64x32xf32>
    %19 = arith.addf %15, %18 : vector<64x32xf32>
    %20 = math.tanh %19 : vector<64x32xf32>
    %cst_9 = arith.constant 1.000000e+00 : f32
    %21 = vector.broadcast %cst_9 : f32 to vector<64x32xf32>
    %22 = arith.subf %21, %14 : vector<64x32xf32>
    %23 = arith.mulf %22, %20 : vector<64x32xf32>
    %c0_10 = arith.constant 0 : index
    %c0_11 = arith.constant 0 : index
    %24 = vector.load %arg5[%c0_10, %c0_11] : memref<32x128xf32, #tpu.memory_space<vmem>>, vector<32x128xf32>
    %cst_12 = arith.constant dense<0.000000e+00> : vector<64x128xf32>
    %25 = tpu.matmul %23, %24, %cst_12 {dimension_numbers = #tpu.dot_dimension_numbers<[1], [0], [0], [1], [0, 0, 1, 1], [], []>} : vector<64x32xf32>, vector<32x128xf32>, vector<64x128xf32> -> vector<64x128xf32>
    %26 = vector.extract_strided_slice %25 {offsets = [0, 0], sizes = [8, 1], strides = [1, 1]} : vector<64x128xf32> to vector<8x1xf32>
    %27 = vector.extract_strided_slice %25 {offsets = [8, 0], sizes = [8, 1], strides = [1, 1]} : vector<64x128xf32> to vector<8x1xf32>
    %28 = vector.extract_strided_slice %25 {offsets = [16, 0], sizes = [8, 1], strides = [1, 1]} : vector<64x128xf32> to vector<8x1xf32>
    %29 = vector.extract_strided_slice %25 {offsets = [24, 0], sizes = [8, 1], strides = [1, 1]} : vector<64x128xf32> to vector<8x1xf32>
    %30 = vector.extract_strided_slice %25 {offsets = [32, 0], sizes = [8, 1], strides = [1, 1]} : vector<64x128xf32> to vector<8x1xf32>
    %31 = vector.extract_strided_slice %25 {offsets = [40, 0], sizes = [8, 1], strides = [1, 1]} : vector<64x128xf32> to vector<8x1xf32>
    %32 = vector.extract_strided_slice %25 {offsets = [48, 0], sizes = [8, 1], strides = [1, 1]} : vector<64x128xf32> to vector<8x1xf32>
    %33 = vector.extract_strided_slice %25 {offsets = [56, 0], sizes = [8, 1], strides = [1, 1]} : vector<64x128xf32> to vector<8x1xf32>
    %34 = arith.maximumf %26, %27 : vector<8x1xf32>
    %35 = arith.maximumf %34, %28 : vector<8x1xf32>
    %36 = arith.maximumf %35, %29 : vector<8x1xf32>
    %37 = arith.maximumf %36, %30 : vector<8x1xf32>
    %38 = arith.maximumf %37, %31 : vector<8x1xf32>
    %39 = arith.maximumf %38, %32 : vector<8x1xf32>
    %40 = arith.maximumf %39, %33 : vector<8x1xf32>
    %41 = arith.subf %26, %40 : vector<8x1xf32>
    %42 = math.exp %41 : vector<8x1xf32>
    %43 = vector.extract_strided_slice %25 {offsets = [0, 0], sizes = [8, 128], strides = [1, 1]} : vector<64x128xf32> to vector<8x128xf32>
    %44 = vector.broadcast %42 : vector<8x1xf32> to vector<8x128xf32>
    %45 = arith.mulf %44, %43 : vector<8x128xf32>
    %46 = arith.subf %27, %40 : vector<8x1xf32>
    %47 = math.exp %46 : vector<8x1xf32>
    %48 = arith.addf %42, %47 : vector<8x1xf32>
    %49 = vector.extract_strided_slice %25 {offsets = [8, 0], sizes = [8, 128], strides = [1, 1]} : vector<64x128xf32> to vector<8x128xf32>
    %50 = vector.broadcast %47 : vector<8x1xf32> to vector<8x128xf32>
    %51 = arith.mulf %50, %49 : vector<8x128xf32>
    %52 = arith.addf %45, %51 : vector<8x128xf32>
    %53 = arith.subf %28, %40 : vector<8x1xf32>
    %54 = math.exp %53 : vector<8x1xf32>
    %55 = arith.addf %48, %54 : vector<8x1xf32>
    %56 = vector.extract_strided_slice %25 {offsets = [16, 0], sizes = [8, 128], strides = [1, 1]} : vector<64x128xf32> to vector<8x128xf32>
    %57 = vector.broadcast %54 : vector<8x1xf32> to vector<8x128xf32>
    %58 = arith.mulf %57, %56 : vector<8x128xf32>
    %59 = arith.addf %52, %58 : vector<8x128xf32>
    %60 = arith.subf %29, %40 : vector<8x1xf32>
    %61 = math.exp %60 : vector<8x1xf32>
    %62 = arith.addf %55, %61 : vector<8x1xf32>
    %63 = vector.extract_strided_slice %25 {offsets = [24, 0], sizes = [8, 128], strides = [1, 1]} : vector<64x128xf32> to vector<8x128xf32>
    %64 = vector.broadcast %61 : vector<8x1xf32> to vector<8x128xf32>
    %65 = arith.mulf %64, %63 : vector<8x128xf32>
    %66 = arith.addf %59, %65 : vector<8x128xf32>
    %67 = arith.subf %30, %40 : vector<8x1xf32>
    %68 = math.exp %67 : vector<8x1xf32>
    %69 = arith.addf %62, %68 : vector<8x1xf32>
    %70 = vector.extract_strided_slice %25 {offsets = [32, 0], sizes = [8, 128], strides = [1, 1]} : vector<64x128xf32> to vector<8x128xf32>
    %71 = vector.broadcast %68 : vector<8x1xf32> to vector<8x128xf32>
    %72 = arith.mulf %71, %70 : vector<8x128xf32>
    %73 = arith.addf %66, %72 : vector<8x128xf32>
    %74 = arith.subf %31, %40 : vector<8x1xf32>
    %75 = math.exp %74 : vector<8x1xf32>
    %76 = arith.addf %69, %75 : vector<8x1xf32>
    %77 = vector.extract_strided_slice %25 {offsets = [40, 0], sizes = [8, 128], strides = [1, 1]} : vector<64x128xf32> to vector<8x128xf32>
    %78 = vector.broadcast %75 : vector<8x1xf32> to vector<8x128xf32>
    %79 = arith.mulf %78, %77 : vector<8x128xf32>
    %80 = arith.addf %73, %79 : vector<8x128xf32>
    %81 = arith.subf %32, %40 : vector<8x1xf32>
    %82 = math.exp %81 : vector<8x1xf32>
    %83 = arith.addf %76, %82 : vector<8x1xf32>
    %84 = vector.extract_strided_slice %25 {offsets = [48, 0], sizes = [8, 128], strides = [1, 1]} : vector<64x128xf32> to vector<8x128xf32>
    %85 = vector.broadcast %82 : vector<8x1xf32> to vector<8x128xf32>
    %86 = arith.mulf %85, %84 : vector<8x128xf32>
    %87 = arith.addf %80, %86 : vector<8x128xf32>
    %88 = arith.subf %33, %40 : vector<8x1xf32>
    %89 = math.exp %88 : vector<8x1xf32>
    %90 = arith.addf %83, %89 : vector<8x1xf32>
    %91 = vector.extract_strided_slice %25 {offsets = [56, 0], sizes = [8, 128], strides = [1, 1]} : vector<64x128xf32> to vector<8x128xf32>
    %92 = vector.broadcast %89 : vector<8x1xf32> to vector<8x128xf32>
    %93 = arith.mulf %92, %91 : vector<8x128xf32>
    %94 = arith.addf %87, %93 : vector<8x128xf32>
    %95 = vector.broadcast %90 : vector<8x1xf32> to vector<8x128xf32>
    %96 = arith.divf %94, %95 : vector<8x128xf32>
    %c0_13 = arith.constant 0 : index
    %c0_14 = arith.constant 0 : index
    %97 = vector.load %arg6[%c0_13, %c0_14] : memref<1x128xf32, #tpu.memory_space<vmem>>, vector<1x128xf32>
    %98 = vector.broadcast %97 : vector<1x128xf32> to vector<8x128xf32>
    %99 = arith.addf %96, %98 : vector<8x128xf32>
    %c0_15 = arith.constant 0 : index
    %c0_16 = arith.constant 0 : index
    %100 = vector.load %arg7[%c0_15, %c0_16] : memref<8x128xf32, #tpu.memory_space<vmem>>, vector<8x128xf32>
    tpu.vector_store %arg7[%c0_15, %c0_16], %99 {strides = array<i32>} : memref<8x128xf32, #tpu.memory_space<vmem>>, vector<8x128xf32>,
    return
  }
  func.func @transform_0(%arg0: i32) -> (i32, i32, i32) {
    %c0_i32 = arith.constant 0 : i32
    %c0_i32_0 = arith.constant 0 : i32
    %c0_i32_1 = arith.constant 0 : i32
    return %c0_i32, %arg0, %c0_i32_0 : i32, i32, i32
  }
  func.func @transform_1(%arg0: i32) -> (i32, i32) {
    %c0_i32 = arith.constant 0 : i32
    %c0_i32_0 = arith.constant 0 : i32
    %c0_i32_1 = arith.constant 0 : i32
    return %c0_i32, %c0_i32_0 : i32, i32
  }
  func.func @transform_2(%arg0: i32) -> (i32, i32) {
    %c0_i32 = arith.constant 0 : i32
    %c0_i32_0 = arith.constant 0 : i32
    %c0_i32_1 = arith.constant 0 : i32
    return %c0_i32, %c0_i32_0 : i32, i32
  }
  func.func @transform_3(%arg0: i32) -> (i32, i32) {
    %c0_i32 = arith.constant 0 : i32
    %c0_i32_0 = arith.constant 0 : i32
    %c0_i32_1 = arith.constant 0 : i32
    return %c0_i32, %c0_i32_0 : i32, i32
  }
  func.func @transform_4(%arg0: i32) -> (i32, i32) {
    %c0_i32 = arith.constant 0 : i32
    %c0_i32_0 = arith.constant 0 : i32
    %c0_i32_1 = arith.constant 0 : i32
    return %c0_i32, %c0_i32_0 : i32, i32
  }
  func.func @transform_5(%arg0: i32) -> (i32, i32) {
    %c0_i32 = arith.constant 0 : i32
    %c0_i32_0 = arith.constant 0 : i32
    %c0_i32_1 = arith.constant 0 : i32
    return %c0_i32, %c0_i32_0 : i32, i32
  }
  func.func @transform_6(%arg0: i32) -> (i32, i32) {
    %c0_i32 = arith.constant 0 : i32
    %c0_i32_0 = arith.constant 0 : i32
    return %arg0, %c0_i32 : i32, i32
  }
}

</mosaic_0001>

<bundles_post_ra>
// kernel: tpu_custom_call.1
= control target key start
LH: loop header
LB: loop body
LE: loop exit
PB: predicated region body
PF: predicated region fallthrough
CT: control target
= control target key end

     0   :  { %11 = vsyncpa [#allocation3], 0  ;;  %s1178_s0 = inlined_call_operand.hbm [shape: f32[8,8,32], index: 0, kind: input, shape index: {}]   ;;  %s1179_s1 = inlined_call_operand.hbm [shape: f32[32,96], index: 1, kind: input, shape index: {}]   ;;  %s1180_s2 = inlined_call_operand.vmem [shape: f32[1,96], index: 2, kind: input, shape index: {}]   ;;  %s1181_s3 = inlined_call_operand.vmem [shape: f32[1,32], index: 3, kind: input, shape index: {}]   ;;  %s1182_s4 = inlined_call_operand.hbm [shape: f32[32,128], index: 4, kind: input, shape index: {}]   ;;  %s1183_s5 = inlined_call_operand.vmem [shape: f32[1,128], index: 5, kind: input, shape index: {}]   ;;  %s1184_s6 = inlined_call_operand.hbm [shape: f32[8,128], index: 6, kind: output, shape index: {}]  }
   0x1   :  { %12 = vsyncpa [#allocation6], 0 }
   0x2   :  { %13 = vsyncpa [#allocation4], 0  ;;  %s925_s21 = smov [#allocation5]   ;;  %s926_s23 = smov [#allocation2]  }
   0x3   :  { %s31_s22 = sshll.u32 %s925_s21, 4  ;;  %s19_s24 = sshll.u32 %s926_s23, 4  ;;  %s32_s22 = int_to_ptr.vmem [resolvable:$true] %s31_s22  ;;  %s969_s24 = int_to_ptr.vmem [resolvable:$true] %s19_s24 }
   0x4   :  { %s831_s27 = scalar_lea.hbm %s1179_s1, 512 }
   0x5   :  { %p832_p0 = scmp.ne.s32.totalorder %s1179_s1, %s831_s27  ;;  %p835_p1 = scmp.lt.u32.totalorder %s831_s27, %s1179_s1 }
   0x7   :  { %p837_p2 = pnand %p835_p1, %p832_p0 }
   0x9   :  { %840 = shalt.err (!%p837_p2)
}
   0xa   :  { %s841_s8 = scalar_lea.vmem %s32_s22, 512  ;;  %p846_p4 = scmp.lt.s32.totalorder %s32_s22, %s32_s22 }
   0xb   :  { %p842_p3 = scmp.ne.s32.totalorder %s32_s22, %s841_s8  ;;  %p847_p5 = scmp.lt.s32.totalorder %s841_s8, %s841_s8 }
   0xd   :  { %p848_p6 = por %p847_p5, %p846_p4 }
   0xf   :  { %p849_p7 = pnand %p848_p6, %p842_p3 }
  0x11   :  { %852 = shalt.err (!%p849_p7)
}
  0x12   :  { %s927_s9 = smov 128   ;;  %s928_s10 = smov 8  }
  0x13   :  { %37 = dma.hbm_to_vmem [thread:$0]  %s1179_s1, 512, %s32_s22, [#allocation6], %s927_s9, %s927_s9, %s928_s10  }
  0x14   :  { %s853_s15 = scalar_lea.hbm %s1178_s0, 1024 }
  0x15   :  { %p854_p8 = scmp.ne.s32.totalorder %s1178_s0, %s853_s15  ;;  %p857_p9 = scmp.lt.u32.totalorder %s853_s15, %s1178_s0 }
  0x17   :  { %p859_p10 = pnand %p857_p9, %p854_p8 }
  0x19   :  { %862 = shalt.err (!%p859_p10)
}
  0x1a   :  { %s863_s20 = scalar_lea.vmem %s969_s24, 1024  ;;  %p868_p12 = scmp.lt.s32.totalorder %s969_s24, %s969_s24 }
  0x1b   :  { %p864_p11 = scmp.ne.s32.totalorder %s969_s24, %s863_s20  ;;  %p869_p13 = scmp.lt.s32.totalorder %s863_s20, %s863_s20 }
  0x1d   :  { %p870_p0 = por %p869_p13, %p868_p12 }
  0x1f   :  { %p871_p1 = pnand %p870_p0, %p864_p11 }
  0x21   :  { %874 = shalt.err (!%p871_p1)
}
  0x22   :  { %25 = dma.hbm_to_vmem [thread:$0]  %s1178_s0, 1024, %s969_s24, [#allocation3], %s927_s9, %s927_s9, %s928_s10  }
  0x23   :  { %s929_s22 = smov [#allocation7]   ;;  %s875_s27 = scalar_lea.hbm %s1182_s4, 512 }
  0x24   :  { %s47_s23 = sshll.u32 %s929_s22, 4  ;;  %p876_p2 = scmp.ne.s32.totalorder %s1182_s4, %s875_s27  ;;  %s48_s23 = int_to_ptr.vmem [resolvable:$true] %s47_s23 }
  0x25   :  { %p879_p3 = scmp.lt.u32.totalorder %s875_s27, %s1182_s4 }
  0x27   :  { %p881_p4 = pnand %p879_p3, %p876_p2 }
  0x29   :  { %884 = shalt.err (!%p881_p4)
}
  0x2a   :  { %s885_s8 = scalar_lea.vmem %s48_s23, 512  ;;  %p890_p6 = scmp.lt.s32.totalorder %s48_s23, %s48_s23 }
  0x2b   :  { %p886_p5 = scmp.ne.s32.totalorder %s48_s23, %s885_s8  ;;  %p891_p7 = scmp.lt.s32.totalorder %s885_s8, %s885_s8 }
  0x2d   :  { %p892_p8 = por %p891_p7, %p890_p6 }
  0x2f   :  { %p893_p9 = pnand %p892_p8, %p886_p5 }
  0x31   :  { %896 = shalt.err (!%p893_p9)
}
  0x32   :  { %53 = dma.hbm_to_vmem [thread:$0]  %s1182_s4, 512, %s48_s23, [#allocation6], %s927_s9, %s927_s9, %s928_s10  }
  0x33   :  { %919 = dma.done.wait [#allocation3], 1024  }
  0x34   :  { %920 = vsyncadd [#allocation3], 4294966272 }
  0x35   :  { %921 = dma.done.wait [#allocation6], 1024  }
  0x36   :  { %922 = vsyncadd [#allocation6], 4294966272  ;;  %vm84_vm0 = vcmask 261120   ;;  %v73_v0 = vld [vmem:[#allocation5] sm:$0xff]  ;;  %v74_v1 = vld [vmem:[#allocation5 + $0x8] sm:$0xff]  ;;  %s930_s11 = smov 64  }
  0x37   :  { %v75_v2 = vld [vmem:[#allocation5 + $0x10] sm:$0xff]  ;;  %v738_v3 = vpack.c.bf16 %v74_v1, %v73_v0  ;;  %v76_v4 = vld [vmem:[#allocation5 + $0x18] sm:$0xff]  ;;  %v65_v5 = vld [vmem:[#allocation2] sm:$0xff]  ;;  %s933_s14 = smov [#allocation8]  }
  0x38   :  { %v742_v6 = vpack.c.bf16 %v76_v4, %v75_v2  ;;  %706 = vmatprep.mubr.msk.f32.mxu0 %vm84_vm0, %v65_v5  ;;  %v66_v7 = vld [vmem:[#allocation2 + $0x8] sm:$0xff]  ;;  %v67_v8 = vld [vmem:[#allocation2 + $0x10] sm:$0xff]  ;;  %v68_v9 = vld [vmem:[#allocation2 + $0x18] sm:$0xff]  ;;  %s637_s15 = sshll.u32 %s933_s14, 4  ;;  %s638_s15 = int_to_ptr.vmem [resolvable:$true] %s637_s15 }
  0x39   :  { %739 = vmatprep.subr.bf16.mxu0 %v738_v3  ;;  %v69_v10 = vld [vmem:[#allocation2 + $0x20] sm:$0xff]  ;;  %v70_v11 = vld [vmem:[#allocation2 + $0x28] sm:$0xff]  ;;  %v71_v12 = vld [vmem:[#allocation2 + $0x30] sm:$0xff]  ;;  %s897_s16 = scalar_lea.vmem %s638_s15, 128  ;;  %p902_p11 = scmp.lt.s32.totalorder %s638_s15, %s638_s15 }
  0x3a   :  { %741 = vmatpush3.bf16.msra.mxu0 %v738_v3  ;;  %v72_v13 = vld [vmem:[#allocation2 + $0x38] sm:$0xff]  ;;  %v647_v14 = vld [vmem:[%s1180_s2] ss:$0 sm:$0xff]  ;;  %p898_p10 = scmp.ne.s32.totalorder %s638_s15, %s897_s16  ;;  %p903_p12 = scmp.lt.s32.totalorder %s897_s16, %s897_s16 }
  0x3b   :  { %743 = vmatprep.subr.bf16.mxu0 %v742_v6  ;;  %v664_v52 = vld [vmem:[%s1181_s3] ss:$0 sm:$0xff]  ;;  %s931_s3 = smov 96  }
  0x3c   :  { %p904_p13 = por %p903_p12, %p902_p11 }
  0x3e   :  { %745 = vmatpush3.bf16.msra.mxu0 %v742_v6  ;;  %p905_p0 = pnand %p904_p13, %p898_p10 }
  0x41   :  { %707 = vmatmul.mubr.msk.f32.vlgmr.msra.gmra.mrb[0].mxu0 %vm84_vm0, %v66_v7 }
  0x42   :  { %709 = vmatprep.mubr.msk.f32.mxu0 %vm84_vm0, %v67_v8 }
  0x45   :  { %710 = vmatmul.mubr.msk.f32.gmra.mrb[2].mxu0 %vm84_vm0, %v68_v9 }
  0x46   :  { %712 = vmatprep.mubr.msk.f32.mxu0 %vm84_vm0, %v69_v10 }
  0x49   :  { %713 = vmatmul.mubr.msk.f32.gmra.mrb[4].mxu0 %vm84_vm0, %v70_v11 }
  0x4a   :  { %715 = vmatprep.mubr.msk.f32.mxu0 %vm84_vm0, %v71_v12 }
  0x4d   :  { %716 = vmatmul.mubr.msk.f32.gmra.mrb[6].mxu0 %vm84_vm0, %v72_v13 }
 0x114   :  { %v708_v15 = vpop.f32.mrb[0].mxu0 }
 0x115   :  { %v1032_v16 = vadd.f32 %v708_v15, %v647_v14  ;;  %v175_v17 = vpop.f32.mrb[1].mxu0 }
 0x116   :  { %v1034_v18 = vadd.f32 %v647_v14, %v175_v17 }
 0x117   :  { %v657_v19 = vmul.f32 -1.442695, %v1032_v16 }
 0x118   :  { %v656_v20 = vmul.f32 -1.442695, %v1034_v18  ;;  %v711_v21 = vpop.f32.mrb[2].mxu0 }
 0x119   :  { %765 = vpow2.f32 %v657_v19  ;;  %v1038_v22 = vadd.f32 %v711_v21, %v647_v14  ;;  %v185_v23 = vpop.f32.mrb[3].mxu0 }
 0x11a   :  { %767 = vpow2.f32 %v656_v20  ;;  %v1040_v24 = vadd.f32 %v647_v14, %v185_v23 }
 0x11b   :  { %v659_v25 = vmul.f32 -1.442695, %v1038_v22 }
 0x11c   :  { %v658_v26 = vmul.f32 -1.442695, %v1040_v24  ;;  %v714_v27 = vpop.f32.mrb[4].mxu0 }
 0x11d   :  { %769 = vpow2.f32 %v659_v25  ;;  %v1044_v28 = vadd.f32 %v714_v27, %v647_v14  ;;  %v195_v29 = vpop.f32.mrb[5].mxu0  ;;  %v373_v27 = vld [vmem:[#allocation7] sm:$0xff] }
 0x11e   :  { %771 = vpow2.f32 %v658_v26  ;;  %v1046_v30 = vadd.f32 %v647_v14, %v195_v29 }
 0x11f   :  { %v661_v31 = vmul.f32 -1.442695, %v1044_v28 }
 0x120   :  { %v660_v32 = vmul.f32 -1.442695, %v1046_v30  ;;  %v717_v33 = vpop.f32.mrb[6].mxu0 }
 0x121   :  { %773 = vpow2.f32 %v661_v31  ;;  %v1050_v34 = vadd.f32 %v717_v33, %v647_v14  ;;  %v205_v35 = vpop.f32.mrb[7].mxu0 }
 0x122   :  { %775 = vpow2.f32 %v660_v32  ;;  %v1052_v36 = vadd.f32 %v647_v14, %v205_v35  ;;  %v375_v35 = vld [vmem:[#allocation7 + $0x10] sm:$0xff] }
 0x123   :  { %v766_v37 = vpop.eup %765  ;;  %v663_v38 = vmul.f32 -1.442695, %v1050_v34 }
 0x124   :  { %v768_v39 = vpop.eup %767  ;;  %v662_v40 = vmul.f32 -1.442695, %v1052_v36  ;;  %v239_v41 = vadd.f32 1.0, %v766_v37 }
 0x125   :  { %v238_v42 = vadd.f32 1.0, %v768_v39  ;;  %777 = vpow2.f32 %v663_v38 }
 0x127   :  { %v770_v43 = vpop.eup %769  ;;  %779 = vrcp.f32 %v238_v42 }
 0x128   :  { %v772_v44 = vpop.eup %771  ;;  %781 = vpow2.f32 %v662_v40  ;;  %v241_v45 = vadd.f32 1.0, %v770_v43 }
 0x129   :  { %783 = vrcp.f32 %v239_v41  ;;  %v240_v46 = vadd.f32 1.0, %v772_v44 }
 0x12b   :  { %v774_v47 = vpop.eup %773  ;;  %785 = vrcp.f32 %v240_v46 }
 0x12c   :  { %v776_v48 = vpop.eup %775  ;;  %787 = vrcp.f32 %v241_v45  ;;  %v243_v49 = vadd.f32 1.0, %v774_v47 }
 0x12d   :  { %v242_v50 = vadd.f32 1.0, %v776_v48 }
 0x12f   :  { %v778_v51 = vpop.eup %777  ;;  %789 = vrcp.f32 %v242_v50 }
 0x130   :  { %v245_v53 = vadd.f32 1.0, %v778_v51  ;;  %791 = vrcp.f32 %v243_v49 }
 0x131   :  { %v1059_v54 = vpop.eup %779 }
 0x132   :  { %v782_v55 = vpop.eup %781  ;;  %v269_v56 = vmul.f32 %v1059_v54, %v664_v52  ;;  %793 = vrcp.f32 %v245_v53  ;;  %v325_v38 = vsub.f32 1.0, %v1059_v54 }
 0x133   :  { %v1062_v57 = vpop.eup %783  ;;  %v244_v58 = vadd.f32 1.0, %v782_v55 }
 0x134   :  { %285 = vrot.lane.b32.xlu0 %v269_v56, %s930_s11  ;;  %v270_v61 = vmul.f32 %v1062_v57, %v664_v52  ;;  %v326_v42 = vsub.f32 1.0, %v1062_v57 }
 0x135   :  { %v1064_v59 = vpop.eup %785  ;;  %795 = vrcp.f32 %v244_v58 }
 0x136   :  { %v271_v60 = vmul.f32 %v1064_v59, %v664_v52  ;;  %v1068_v62 = vpop.eup %787  ;;  %v327_v41 = vsub.f32 1.0, %v1064_v59 }
 0x137   :  { %v272_v0 = vmul.f32 %v1068_v62, %v664_v52  ;;  %v328_v47 = vsub.f32 1.0, %v1068_v62 }
 0x138   :  { %289 = vrot.lane.b32.xlu1 %v271_v60, %s930_s11  ;;  %287 = vrot.lane.b32.xlu0 %v270_v61, %s930_s11 }
 0x139   :  { %v1070_v63 = vpop.eup %789 }
 0x13a   :  { %v273_v1 = vmul.f32 %v1070_v63, %v664_v52  ;;  %v1074_v2 = vpop.eup %791  ;;  %v329_v48 = vsub.f32 1.0, %v1070_v63 }
 0x13b   :  { %v274_v4 = vmul.f32 %v1074_v2, %v664_v52  ;;  %v330_v53 = vsub.f32 1.0, %v1074_v2 }
 0x13c   :  { %291 = vrot.lane.b32.xlu1 %v272_v0, %s930_s11  ;;  %293 = vrot.lane.b32.xlu0 %v273_v1, %s930_s11  ;;  %v1076_v3 = vpop.eup %793 }
 0x13d   :  { %v276_v7 = vmul.f32 %v1076_v3, %v664_v52  ;;  %v332_v59 = vsub.f32 1.0, %v1076_v3 }
 0x13f   :  { %v1079_v5 = vpop.eup %795 }
 0x140   :  { %295 = vrot.lane.b32.xlu1 %v274_v4, %s930_s11  ;;  %v275_v6 = vmul.f32 %v1079_v5, %v664_v52  ;;  %v331_v55 = vsub.f32 1.0, %v1079_v5 }
 0x142   :  { %297 = vrot.lane.b32.xlu0 %v275_v6, %s930_s11  ;;  %v932_v6 = vmov 0  }
 0x143   :  { %764 = vset.pattern.permute.xlu1 %v932_v6  ;;  %763 = vset.pattern.permute.xlu0 %v932_v6 }
 0x144   :  { %299 = vrot.lane.b32.xlu1 %v276_v7, %s930_s11 }
 0x1a6   :  { %v286_v8 = vpop.permute.xlu0 %285 }
 0x1a7   :  { %v309_v9 = vadd.f32 %v286_v8, %v1034_v18 }
 0x1a9   :  { %797 = vtanh.f32 %v309_v9 }
 0x1aa   :  { %v290_v10 = vpop.permute.xlu1 %289  ;;  %v288_v11 = vpop.permute.xlu0 %287 }
 0x1ab   :  { %v311_v12 = vadd.f32 %v290_v10, %v1040_v24  ;;  %v310_v13 = vadd.f32 %v288_v11, %v1032_v16 }
 0x1ad   :  { %799 = vtanh.f32 %v311_v12 }
 0x1ae   :  { %801 = vtanh.f32 %v310_v13  ;;  %v292_v14 = vpop.permute.xlu1 %291  ;;  %v294_v15 = vpop.permute.xlu0 %293 }
 0x1af   :  { %v312_v17 = vadd.f32 %v292_v14, %v1038_v22  ;;  %v313_v19 = vadd.f32 %v294_v15, %v1046_v30 }
 0x1b1   :  { %803 = vtanh.f32 %v312_v17 }
 0x1b2   :  { %805 = vtanh.f32 %v313_v19  ;;  %v296_v20 = vpop.permute.xlu1 %295 }
 0x1b3   :  { %v798_v21 = vpop.eup %797  ;;  %v314_v18 = vadd.f32 %v296_v20, %v1044_v28  ;;  %v374_v28 = vld [vmem:[#allocation7 + $0x8] sm:$0xff] }
 0x1b4   :  { %v298_v23 = vpop.permute.xlu0 %297  ;;  %341 = vrot.lane.b32.xlu0 %v798_v21, %s931_s3  ;;  %v746_v30 = vpack.c.bf16 %v374_v28, %v373_v27 }
 0x1b5   :  { %807 = vtanh.f32 %v314_v18  ;;  %v315_v16 = vadd.f32 %v298_v23, %v1052_v36  ;;  %v376_v36 = vld [vmem:[#allocation7 + $0x18] sm:$0xff] }
 0x1b6   :  { %v300_v24 = vpop.permute.xlu1 %299  ;;  %747 = vmatprep.subr.bf16.mxu1 %v746_v30  ;;  %v750_v37 = vpack.c.bf16 %v376_v36, %v375_v35 }
 0x1b7   :  { %v800_v25 = vpop.eup %799  ;;  %809 = vtanh.f32 %v315_v16  ;;  %v316_v22 = vadd.f32 %v300_v24, %v1050_v34  ;;  %749 = vmatpush3.bf16.msra.mxu1 %v746_v30 }
 0x1b8   :  { %v802_v26 = vpop.eup %801  ;;  %345 = vrot.lane.b32.xlu0 %v800_v25, %s931_s3  ;;  %751 = vmatprep.subr.bf16.mxu1 %v750_v37 }
 0x1b9   :  { %811 = vtanh.f32 %v316_v22  ;;  %343 = vrot.lane.b32.xlu1 %v802_v26, %s931_s3 }
 0x1bb   :  { %v804_v29 = vpop.eup %803  ;;  %753 = vmatpush3.bf16.msra.mxu1 %v750_v37 }
 0x1bc   :  { %v806_v31 = vpop.eup %805 }
 0x1bd   :  { %347 = vrot.lane.b32.xlu1 %v804_v29, %s931_s3  ;;  %349 = vrot.lane.b32.xlu0 %v806_v31, %s931_s3 }
 0x1bf   :  { %v808_v32 = vpop.eup %807 }
 0x1c1   :  { %v810_v33 = vpop.eup %809  ;;  %351 = vrot.lane.b32.xlu1 %v808_v32, %s931_s3 }
 0x1c2   :  { %353 = vrot.lane.b32.xlu0 %v810_v33, %s931_s3 }
 0x1c3   :  { %v812_v34 = vpop.eup %811 }
 0x1c5   :  { %355 = vrot.lane.b32.xlu1 %v812_v34, %s931_s3 }
 0x226   :  { %v342_v39 = vpop.permute.xlu0 %341 }
 0x227   :  { %v365_v40 = vmul.f32 %v342_v39, %v325_v38 }
 0x229   :  { %385 = vrot.lane.b32.xlu0 %v365_v40, %s931_s3 }
 0x22a   :  { %v346_v43 = vpop.permute.xlu0 %345 }
 0x22b   :  { %v344_v44 = vpop.permute.xlu1 %343  ;;  %v367_v45 = vmul.f32 %v346_v43, %v327_v41 }
 0x22c   :  { %v366_v46 = vmul.f32 %v344_v44, %v326_v42 }
 0x22d   :  { %389 = vrot.lane.b32.xlu0 %v367_v45, %s931_s3 }
 0x22e   :  { %387 = vrot.lane.b32.xlu1 %v366_v46, %s931_s3 }
 0x22f   :  { %v348_v49 = vpop.permute.xlu1 %347  ;;  %v350_v50 = vpop.permute.xlu0 %349 }
 0x230   :  { %v368_v51 = vmul.f32 %v348_v49, %v328_v47  ;;  %v369_v52 = vmul.f32 %v350_v50, %v329_v48 }
 0x232   :  { %391 = vrot.lane.b32.xlu1 %v368_v51, %s931_s3  ;;  %393 = vrot.lane.b32.xlu0 %v369_v52, %s931_s3 }
 0x233   :  { %v352_v54 = vpop.permute.xlu1 %351 }
 0x234   :  { %v370_v56 = vmul.f32 %v352_v54, %v330_v53  ;;  %v354_v57 = vpop.permute.xlu0 %353 }
 0x235   :  { %v371_v58 = vmul.f32 %v354_v57, %v331_v55 }
 0x236   :  { %395 = vrot.lane.b32.xlu1 %v370_v56, %s931_s3 }
 0x237   :  { %397 = vrot.lane.b32.xlu0 %v371_v58, %s931_s3  ;;  %v356_v60 = vpop.permute.xlu1 %355 }
 0x238   :  { %v372_v61 = vmul.f32 %v356_v60, %v332_v59 }
 0x23a   :  { %399 = vrot.lane.b32.xlu1 %v372_v61, %s931_s3 }
 0x29b   :  { %v386_v62 = vpop.permute.xlu0 %385 }
 0x29c   :  { %726 = vmatprep.mubr.msk.f32.mxu1 %vm84_vm0, %v386_v62 }
 0x29f   :  { %v390_v63 = vpop.permute.xlu0 %389 }
 0x2a0   :  { %v388_v0 = vpop.permute.xlu1 %387 }
 0x2a1   :  { %727 = vmatmul.mubr.msk.f32.vlgmr.msra.gmra.mrb[0].mxu1 %vm84_vm0, %v388_v0 }
 0x2a2   :  { %729 = vmatprep.mubr.msk.f32.mxu1 %vm84_vm0, %v390_v63 }
 0x2a4   :  { %v392_v1 = vpop.permute.xlu1 %391  ;;  %v394_v2 = vpop.permute.xlu0 %393 }
 0x2a5   :  { %730 = vmatmul.mubr.msk.f32.gmra.mrb[2].mxu1 %vm84_vm0, %v392_v1 }
 0x2a6   :  { %732 = vmatprep.mubr.msk.f32.mxu1 %vm84_vm0, %v394_v2 }
 0x2a8   :  { %v396_v3 = vpop.permute.xlu1 %395 }
 0x2a9   :  { %v398_v4 = vpop.permute.xlu0 %397  ;;  %733 = vmatmul.mubr.msk.f32.gmra.mrb[4].mxu1 %vm84_vm0, %v396_v3 }
 0x2aa   :  { %735 = vmatprep.mubr.msk.f32.mxu1 %vm84_vm0, %v398_v4 }
 0x2ac   :  { %v400_v5 = vpop.permute.xlu1 %399 }
 0x2ad   :  { %736 = vmatmul.mubr.msk.f32.gmra.mrb[6].mxu1 %vm84_vm0, %v400_v5 }
 0x374   :  { %v1123_v7 = vpop.f32.mrb[0].mxu1 }
 0x375   :  { %v1125_v8 = vpop.f32.mrb[1].mxu1 }
 0x376   :  { %v522_v9 = vmax.f32 %v1125_v8, %v1123_v7 }
 0x378   :  { %v1129_v10 = vpop.f32.mrb[2].mxu1 }
 0x379   :  { %v1131_v11 = vpop.f32.mrb[3].mxu1 }
 0x37a   :  { %v523_v12 = vmax.f32 %v522_v9, %v1131_v11 }
 0x37c   :  { %v1134_v13 = vpop.f32.mrb[4].mxu1  ;;  %v524_v14 = vmax.f32 %v523_v12, %v1129_v10 }
 0x37d   :  { %v1137_v15 = vpop.f32.mrb[5].mxu1 }
 0x37e   :  { %v525_v17 = vmax.f32 %v524_v14, %v1137_v15 }
 0x380   :  { %v1140_v19 = vpop.f32.mrb[6].mxu1  ;;  %v526_v20 = vmax.f32 %v525_v17, %v1134_v13 }
 0x381   :  { %v1143_v21 = vpop.f32.mrb[7].mxu1 }
 0x382   :  { %v527_v18 = vmax.f32 %v526_v20, %v1143_v21 }
 0x384   :  { %v528_v23 = vmax.f32 %v527_v18, %v1140_v19 }
 0x386   :  { %v593_v16 = vsub.f32 %v1143_v21, %v528_v23  ;;  %v538_v24 = vsub.f32 %v1123_v7, %v528_v23  ;;  %v529_v25 = vsub.f32 %v1125_v8, %v528_v23  ;;  %v549_v22 = vsub.f32 %v1131_v11, %v528_v23 }
 0x387   :  { %v560_v26 = vsub.f32 %v1129_v10, %v528_v23  ;;  %v571_v27 = vsub.f32 %v1137_v15, %v528_v23  ;;  %v582_v28 = vsub.f32 %v1134_v13, %v528_v23  ;;  %v604_v29 = vsub.f32 %v1140_v19, %v528_v23 }
 0x388   :  { %v539_v30 = vmul.f32 1.442695, %v538_v24  ;;  %v530_v31 = vmul.f32 1.442695, %v529_v25  ;;  %v550_v32 = vmul.f32 1.442695, %v549_v22 }
 0x389   :  { %v561_v33 = vmul.f32 1.442695, %v560_v26  ;;  %v572_v34 = vmul.f32 1.442695, %v571_v27  ;;  %v583_v35 = vmul.f32 1.442695, %v582_v28 }
 0x38a   :  { %813 = vpow2.f32 %v539_v30  ;;  %v594_v36 = vmul.f32 1.442695, %v593_v16  ;;  %v605_v37 = vmul.f32 1.442695, %v604_v29 }
 0x38b   :  { %815 = vpow2.f32 %v530_v31 }
 0x38c   :  { %817 = vpow2.f32 %v550_v32 }
 0x38d   :  { %819 = vpow2.f32 %v561_v33 }
 0x38e   :  { %821 = vpow2.f32 %v572_v34 }
 0x38f   :  { %823 = vpow2.f32 %v583_v35 }
 0x390   :  { %825 = vpow2.f32 %v594_v36 }
 0x391   :  { %827 = vpow2.f32 %v605_v37 }
 0x394   :  { %v814_v38 = vpop.eup %813 }
 0x395   :  { %v816_v39 = vpop.eup %815  ;;  %544 = vperm.xlu1 %764, %v814_v38  }
 0x396   :  { %534 = vperm.xlu0 %763, %v816_v39   ;;  %v541_v40 = vadd.f32 %v816_v39, %v814_v38  ;;  %v818_v41 = vpop.eup %817 }
 0x397   :  { %v820_v43 = vpop.eup %819 }
 0x398   :  { %v552_v42 = vadd.f32 %v818_v41, %v541_v40  ;;  %v822_v45 = vpop.eup %821 }
 0x399   :  { %555 = vperm.xlu1 %764, %v818_v41   ;;  %v824_v47 = vpop.eup %823 }
 0x39a   :  { %566 = vperm.xlu0 %763, %v820_v43   ;;  %v563_v44 = vadd.f32 %v820_v43, %v552_v42  ;;  %v826_v49 = vpop.eup %825 }
 0x39b   :  { %v828_v51 = vpop.eup %827 }
 0x39c   :  { %v574_v46 = vadd.f32 %v822_v45, %v563_v44 }
 0x39e   :  { %577 = vperm.xlu0 %763, %v822_v45   ;;  %v585_v48 = vadd.f32 %v824_v47, %v574_v46 }
 0x3a0   :  { %v596_v50 = vadd.f32 %v826_v49, %v585_v48 }
 0x3a2   :  { %599 = vperm.xlu0 %763, %v826_v49   ;;  %v607_v52 = vadd.f32 %v828_v51, %v596_v50 }
 0x3a4   :  { %617 = vperm.xlu1 %764, %v607_v52  }
 0x3a8   :  { %588 = vperm.xlu1 %764, %v824_v47  }
 0x3ac   :  { %610 = vperm.xlu1 %764, %v828_v51  }
 0x414   :  { %v545_v53 = vpop.permute.xlu1 %544 }
 0x415   :  { %v547_v54 = vmul.f32 %v1123_v7, %v545_v53  ;;  %v535_v55 = vpop.permute.xlu0 %534 }
 0x416   :  { %v537_v56 = vmul.f32 %v535_v55, %v1125_v8 }
 0x418   :  { %v548_v57 = vadd.f32 %v547_v54, %v537_v56  ;;  %v556_v58 = vpop.permute.xlu1 %555 }
 0x419   :  { %v558_v59 = vmul.f32 %v556_v58, %v1131_v11  ;;  %v567_v60 = vpop.permute.xlu0 %566 }
 0x41a   :  { %v569_v62 = vmul.f32 %v1129_v10, %v567_v60 }
 0x41b   :  { %v559_v61 = vadd.f32 %v558_v59, %v548_v57 }
 0x41d   :  { %v570_v63 = vadd.f32 %v569_v62, %v559_v61  ;;  %v578_v0 = vpop.permute.xlu0 %577 }
 0x41e   :  { %v580_v1 = vmul.f32 %v578_v0, %v1137_v15  ;;  %v673_v15 = vld [vmem:[%s1183_s5] ss:$0 sm:$0xff] }
 0x420   :  { %v581_v2 = vadd.f32 %v580_v1, %v570_v63 }
 0x421   :  { %v600_v4 = vpop.permute.xlu0 %599 }
 0x422   :  { %v602_v7 = vmul.f32 %v600_v4, %v1143_v21 }
 0x423   :  { %v618_v3 = vpop.permute.xlu1 %617 }
 0x424   :  { %829 = vrcp.f32 %v618_v3 }
 0x427   :  { %v589_v5 = vpop.permute.xlu1 %588 }
 0x428   :  { %v591_v6 = vmul.f32 %v1134_v13, %v589_v5 }
 0x42a   :  { %v592_v8 = vadd.f32 %v591_v6, %v581_v2 }
 0x42b   :  { %v611_v9 = vpop.permute.xlu1 %610 }
 0x42c   :  { %v603_v11 = vadd.f32 %v602_v7, %v592_v8  ;;  %v613_v12 = vmul.f32 %v1140_v19, %v611_v9 }
 0x42e   :  { %v830_v14 = vpop.eup %829  ;;  %v614_v10 = vadd.f32 %v613_v12, %v603_v11 }
 0x430   :  { %v621_v17 = vmul.f32 %v830_v14, %v614_v10 }
 0x432   :  { %v629_v20 = vadd.f32 %v673_v15, %v621_v17 }
 0x434   :  { %630 = vst [vmem:[#allocation8] sm:$0xff] %v629_v20 }
 0x435   :  { %908 = shalt.err (!%p905_p0)
}
 0x436   :  { %s909_s19 = scalar_lea.hbm %s1184_s6, 128 }
 0x437   :  { %p910_p1 = scmp.ne.s32.totalorder %s1184_s6, %s909_s19  ;;  %p913_p2 = scmp.lt.u32.totalorder %s909_s19, %s1184_s6 }
 0x439   :  { %p915_p3 = pnand %p913_p2, %p910_p1 }
 0x43b   :  { %918 = shalt.err (!%p915_p3)
}
 0x43c   :  { %640 = dma.vmem_to_hbm [thread:$0]  %s638_s15, 128, %s1184_s6, [#allocation4]  }
 0x43d   :  { %923 = dma.done.wait [#allocation4], 128  }
 0x43e   :  { %924 = vsyncadd [#allocation4], 4294967168 }
 0x43f   :  { %644 = vsyncpa [#allocation3], 1 }
 0x440   :  { %645 = vsyncpa [#allocation6], 1 }
 0x441   :  { %646 = vsyncpa [#allocation4], 1 }

</bundles_post_ra>
